<compile_context>
chip_gen: v5e
topology: v5e:2x2
jax: 0.10.0
libtpu: 0.0.40
codegen_flags: <defaults>
</compile_context>

<pallas_src>
from typing import Dict, Tuple

import jax
import jax.numpy as jnp
from jax.experimental import pallas as pl
from jax.experimental.pallas import tpu as pltpu


def _round_up(x: int, m: int) -> int:
    return ((x + m - 1) // m) * m


def _pick_tile(dim: int, cap: int, mult: int) -> int:
    """Largest tile t <= cap with t % mult == 0 and dim % t == 0.

    `dim` is always a multiple of `mult`, so `mult` itself is a valid fallback.
    """
    t = min(cap, dim)
    t = (t // mult) * mult
    while t > mult and dim % t != 0:
        t -= mult
    return max(t, mult)


def _linear_kernel_f32(x_ref, w_ref, b_ref, o_ref):
    """f32-output path: accumulate directly into the resident output tile."""
    k = pl.program_id(2)

    @pl.when(k == 0)
    def _init():
        o_ref[...] = jnp.zeros_like(o_ref)

    # bf16 operands, f32 accumulation on the MXU.
    o_ref[...] += jnp.dot(x_ref[...], w_ref[...], preferred_element_type=jnp.float32)

    @pl.when(k == pl.num_programs(2) - 1)
    def _epilogue():
        # Bias added once, in the epilogue (kept out of the K loop).
        o_ref[...] += b_ref[...]


def _linear_kernel_acc(x_ref, w_ref, b_ref, o_ref, acc_ref):
    """Narrow-output path: f32 VMEM accumulator, cast on the final K step."""
    k = pl.program_id(2)

    @pl.when(k == 0)
    def _init():
        acc_ref[...] = jnp.zeros_like(acc_ref)

    acc_ref[...] += jnp.dot(x_ref[...], w_ref[...], preferred_element_type=jnp.float32)

    @pl.when(k == pl.num_programs(2) - 1)
    def _epilogue():
        o_ref[...] = (acc_ref[...] + b_ref[...]).astype(o_ref.dtype)


def pallas_linear_padded(xp: jax.Array, wp: jax.Array, bp: jax.Array,
                         out_dtype) -> jax.Array:
    """y = xp @ wp + bp on pre-padded operands.

    xp: [Mp, Kp] bf16 (Mp % 16 == 0, Kp % 128 == 0)
    wp: [Kp, Np] bf16 (Np % 128 == 0)  -- pre-padded/cast once at init time
    bp: [1, Np] f32
    Returns the full padded [Mp, Np] result in `out_dtype`.
    """
    Mp, Kp = xp.shape
    Kw, Np = wp.shape
    assert Kp == Kw and bp.shape == (1, Np)
    assert Mp % 16 == 0 and Kp % 128 == 0 and Np % 128 == 0

    # Tiles are divisors of the (hardware-minimum) padded dims, capped at
    # 512/512/1024: ~6-7 MiB per step with double buffering, which fits the
    # scoped-VMEM budget on v5e/v6e (128 MiB phys) and v7x (64 MiB phys).
    tm = _pick_tile(Mp, 512, 16)
    tn = _pick_tile(Np, 512, 128)
    tk = _pick_tile(Kp, 1024, 128)

    # v7x megacore: guarantee >= 2 parallel output tiles when the shape allows
    # so both TensorCores get work (no effect on single-TC v5e/v6e).
    if Mp // tm == 1 and Np // tn == 1:
        if Np >= 256:
            tn = _pick_tile(Np, Np // 2, 128)
        elif Mp >= 32:
            tm = _pick_tile(Mp, Mp // 2, 16)

    grid = (Mp // tm, Np // tn, Kp // tk)

    out_itemsize = jnp.dtype(out_dtype).itemsize
    cost = pl.CostEstimate(
        flops=2 * Mp * Kp * Np,
        transcendentals=0,
        bytes_accessed=(xp.size * 2 + wp.size * 2 + bp.size * 4
                        + Mp * Np * out_itemsize),
    )

    in_specs = [
        pl.BlockSpec((tm, tk), lambda i, j, k: (i, k)),
        pl.BlockSpec((tk, tn), lambda i, j, k: (k, j)),
        # Bias block reused across all M tiles and K steps.
        pl.BlockSpec((1, tn), lambda i, j, k: (0, j)),
    ]
    out_spec = pl.BlockSpec((tm, tn), lambda i, j, k: (i, j))

    if jnp.dtype(out_dtype) == jnp.dtype(jnp.float32):
        kernel = _linear_kernel_f32
        scratch = []          # accumulate directly in o_ref: saves tm*tn*4 B VMEM
    else:
        kernel = _linear_kernel_acc
        scratch = [pltpu.VMEM((tm, tn), jnp.float32)]

    return pl.pallas_call(
        kernel,
        out_shape=jax.ShapeDtypeStruct((Mp, Np), out_dtype),
        grid_spec=pltpu.PrefetchScalarGridSpec(
            num_scalar_prefetch=0,
            grid=grid,
            in_specs=in_specs,
            out_specs=out_spec,
            scratch_shapes=scratch,
        ),
        compiler_params=pltpu.CompilerParams(
            dimension_semantics=("parallel", "parallel", "arbitrary"),
            vmem_limit_bytes=32 * 1024 * 1024,
        ),
        cost_estimate=cost,
    )(xp, wp, bp)


def _pad_cast_activations(x: jax.Array, k_pad: int) -> jax.Array:
    """Pad [M, K] to [round_up(M,16), k_pad] (zeros) and cast to bf16."""
    M, K = x.shape
    Mp = _round_up(max(M, 16), 16)
    pad_m, pad_k = Mp - M, k_pad - K
    if pad_m or pad_k:
        x = jnp.pad(x, ((0, pad_m), (0, pad_k)))
    return x.astype(jnp.bfloat16)


class ModelInterface:
    """JAX/Pallas counterpart of the PyTorch ModelInterface.

    Holds (input_shape, output_shape, name); forward() maps a dict of arrays
    to a dict of arrays. The base PyTorch class leaves forward abstract; here
    it is realized as one Pallas-backed dense projection shared by all dict
    entries, fused into a single kernel launch per forward().
    """

    def __init__(self, input_shape: Tuple[int, ...], output_shape: Tuple[int, ...], name: str):
        self.input_shape = tuple(input_shape)
        self.output_shape = tuple(output_shape)
        self.name = name

        h_in = 1
        for d in self.input_shape[1:]:
            h_in *= d
        h_out = 1
        for d in self.output_shape[1:]:
            h_out *= d
        self.h_in = h_in
        self.h_out = h_out

        # Hardware-minimum padded parameter dims (lane axis multiple of 128).
        self.k_pad = _round_up(h_in, 128)
        self.n_pad = _round_up(h_out, 128)

        # Deterministic synthetic parameters (no checkpoint load).
        kw, kb = jax.random.split(jax.random.PRNGKey(42))
        scale = 1.0 / jnp.sqrt(jnp.float32(h_in))
        self.weight = jax.random.normal(kw, (h_in, h_out), jnp.float32) * scale
        self.bias = jax.random.normal(kb, (1, h_out), jnp.float32) * 0.01

        # Perf: pad + cast the weight/bias ONCE here so every forward streams
        # a single pre-padded bf16 weight panel from HBM (no per-call f32 read
        # + bf16 rewrite in XLA before the kernel starts).
        self.weight_padded = jnp.pad(
            self.weight, ((0, self.k_pad - h_in), (0, self.n_pad - h_out))
        ).astype(jnp.bfloat16)
        self.bias_padded = jnp.pad(
            self.bias, ((0, 0), (0, self.n_pad - h_out))
        ).astype(jnp.float32)

    def forward(self, x: Dict[str, jax.Array]) -> Dict[str, jax.Array]:
        # TODO(synk): reference forward is abstract (NotImplementedError);
        # this concrete realization applies one shared dense layer to every
        # dict entry, fused into a single Pallas launch.
        keys = list(x.keys())
        flats = []
        batches = []
        out_dtype = None
        for key in keys:
            val = x[key]
            batch = val.shape[0]
            flat = val.reshape(batch, -1)
            assert flat.shape[1] == self.h_in, (
                f"entry '{key}': prod(shape[1:])={flat.shape[1]} != {self.h_in}")
            flats.append(flat)
            batches.append(batch)
            if out_dtype is None:
                out_dtype = flat.dtype

        # NOTE: concat + post-slice costs one extra activation copy in XLA;
        # acceptable here since activation bytes << weight bytes at small batch.
        fused = flats[0] if len(flats) == 1 else jnp.concatenate(flats, axis=0)
        M = fused.shape[0]

        xp = _pad_cast_activations(fused, self.k_pad)
        yp = pallas_linear_padded(xp, self.weight_padded, self.bias_padded, out_dtype)
        y_all = yp[:M, :self.h_out]

        out = {}
        off = 0
        for key, batch in zip(keys, batches):
            y = y_all[off:off + batch]
            off += batch
            out[key] = y.reshape((batch,) + self.output_shape[1:])
        return out

    def __call__(self, x: Dict[str, jax.Array]) -> Dict[str, jax.Array]:
        return self.forward(x)

    def report_metrics(self) -> Dict[str, jax.Array]:
        return {}


if __name__ == "__main__":
    # Small shapes consistent with the interface: batch=8, hidden_in=32 -> hidden_out=16.
    B, H_IN, H_OUT = 8, 32, 16
    model = ModelInterface(input_shape=(B, H_IN), output_shape=(B, H_OUT), name="pallas_iface")

    key = jax.random.PRNGKey(0)
    k1, k2 = jax.random.split(key)
    x1 = jax.random.normal(k1, (B, H_IN), jnp.float32)
    x2 = jax.random.normal(k2, (B, H_IN), jnp.float32)

    # Two dict entries -> exercised as ONE fused Pallas launch.
    out = model({"x": x1, "aux": x2})
    y1 = jax.block_until_ready(out["x"])
    y2 = jax.block_until_ready(out["aux"])

    # Correctness check against a plain-JAX reference using the same bf16
    # operand rounding the kernel applies (f32 accumulation in both).
    w32 = model.weight.astype(jnp.bfloat16).astype(jnp.float32)

    def ref(xv):
        return xv.astype(jnp.bfloat16).astype(jnp.float32) @ w32 + model.bias

    assert y1.shape == (B, H_OUT) and y2.shape == (B, H_OUT)
    assert jnp.allclose(y1, ref(x1), atol=1e-3, rtol=1e-3)
    assert jnp.allclose(y2, ref(x2), atol=1e-3, rtol=1e-3)
    assert model.report_metrics() == {}

    print("KERNEL_OK")
</pallas_src>

<mosaic_0001>
module attributes {stable_mosaic.version = 11 : i64} {
  func.func @_linear_kernel_f32(%arg0: i32, %arg1: i32, %arg2: i32, %arg3: memref<16x128xbf16, #tpu.memory_space<vmem>>, %arg4: memref<128x128xbf16, #tpu.memory_space<vmem>>, %arg5: memref<1x128xf32, #tpu.memory_space<vmem>>, %arg6: memref<16x128xf32, #tpu.memory_space<vmem>>) attributes {dimension_semantics = [#tpu.dimension_semantics<parallel>, #tpu.dimension_semantics<parallel>, #tpu.dimension_semantics<arbitrary>], iteration_bounds = array<i64: 1, 1, 1>, scalar_prefetch = 0 : i64, scratch_operands = 0 : i64, tpu.core_type = #tpu.core_type<tc>, window_params = [{transform_indices = @transform_0, window_bounds = array<i64: 16, 128>}, {transform_indices = @transform_1, window_bounds = array<i64: 128, 128>}, {transform_indices = @transform_2, window_bounds = array<i64: 1, 128>}, {transform_indices = @transform_3, window_bounds = array<i64: 16, 128>}]} {
    %c0_i32 = arith.constant 0 : i32
    %0 = arith.cmpi eq, %arg2, %c0_i32 : i32
    %1 = arith.extui %0 : i1 to i32
    %c0_i32_0 = arith.constant 0 : i32
    %2 = arith.cmpi ne, %1, %c0_i32_0 : i32
    scf.if %2 {
      %cst_10 = arith.constant 0.000000e+00 : f32
      %12 = vector.broadcast %cst_10 : f32 to vector<16x128xf32>
      %c0_11 = arith.constant 0 : index
      %c0_12 = arith.constant 0 : index
      %13 = vector.load %arg6[%c0_11, %c0_12] : memref<16x128xf32, #tpu.memory_space<vmem>>, vector<16x128xf32>
      tpu.vector_store %arg6[%c0_11, %c0_12], %12 {strides = array<i32>} : memref<16x128xf32, #tpu.memory_space<vmem>>, vector<16x128xf32>,
    } else {
    }
    %c0 = arith.constant 0 : index
    %c0_1 = arith.constant 0 : index
    %3 = vector.load %arg6[%c0, %c0_1] : memref<16x128xf32, #tpu.memory_space<vmem>>, vector<16x128xf32>
    %c0_2 = arith.constant 0 : index
    %c0_3 = arith.constant 0 : index
    %4 = vector.load %arg3[%c0_2, %c0_3] : memref<16x128xbf16, #tpu.memory_space<vmem>>, vector<16x128xbf16>
    %c0_4 = arith.constant 0 : index
    %c0_5 = arith.constant 0 : index
    %5 = vector.load %arg4[%c0_4, %c0_5] : memref<128x128xbf16, #tpu.memory_space<vmem>>, vector<128x128xbf16>
    %cst = arith.constant dense<0.000000e+00> : vector<16x128xf32>
    %6 = tpu.matmul %4, %5, %cst {dimension_numbers = #tpu.dot_dimension_numbers<[1], [0], [0], [1], [0, 0, 1, 1], [], []>} : vector<16x128xbf16>, vector<128x128xbf16>, vector<16x128xf32> -> vector<16x128xf32>
    %7 = arith.addf %3, %6 : vector<16x128xf32>
    %c0_6 = arith.constant 0 : index
    %c0_7 = arith.constant 0 : index
    %8 = vector.load %arg6[%c0_6, %c0_7] : memref<16x128xf32, #tpu.memory_space<vmem>>, vector<16x128xf32>
    tpu.vector_store %arg6[%c0_6, %c0_7], %7 {strides = array<i32>} : memref<16x128xf32, #tpu.memory_space<vmem>>, vector<16x128xf32>,
    %c0_i32_8 = arith.constant 0 : i32
    %9 = arith.cmpi eq, %arg2, %c0_i32_8 : i32
    %10 = arith.extui %9 : i1 to i32
    %c0_i32_9 = arith.constant 0 : i32
    %11 = arith.cmpi ne, %10, %c0_i32_9 : i32
    scf.if %11 {
      %c0_10 = arith.constant 0 : index
      %c0_11 = arith.constant 0 : index
      %12 = vector.load %arg6[%c0_10, %c0_11] : memref<16x128xf32, #tpu.memory_space<vmem>>, vector<16x128xf32>
      %c0_12 = arith.constant 0 : index
      %c0_13 = arith.constant 0 : index
      %13 = vector.load %arg5[%c0_12, %c0_13] : memref<1x128xf32, #tpu.memory_space<vmem>>, vector<1x128xf32>
      %14 = vector.broadcast %13 : vector<1x128xf32> to vector<16x128xf32>
      %15 = arith.addf %12, %14 : vector<16x128xf32>
      %c0_14 = arith.constant 0 : index
      %c0_15 = arith.constant 0 : index
      %16 = vector.load %arg6[%c0_14, %c0_15] : memref<16x128xf32, #tpu.memory_space<vmem>>, vector<16x128xf32>
      tpu.vector_store %arg6[%c0_14, %c0_15], %15 {strides = array<i32>} : memref<16x128xf32, #tpu.memory_space<vmem>>, vector<16x128xf32>,
    } else {
    }
    return
  }
  func.func @transform_0(%arg0: i32, %arg1: i32, %arg2: i32) -> (i32, i32) {
    %c0_i32 = arith.constant 0 : i32
    return %arg0, %arg2 : i32, i32
  }
  func.func @transform_1(%arg0: i32, %arg1: i32, %arg2: i32) -> (i32, i32) {
    %c0_i32 = arith.constant 0 : i32
    return %arg2, %arg1 : i32, i32
  }
  func.func @transform_2(%arg0: i32, %arg1: i32, %arg2: i32) -> (i32, i32) {
    %c0_i32 = arith.constant 0 : i32
    %c0_i32_0 = arith.constant 0 : i32
    return %c0_i32, %arg1 : i32, i32
  }
  func.func @transform_3(%arg0: i32, %arg1: i32, %arg2: i32) -> (i32, i32) {
    %c0_i32 = arith.constant 0 : i32
    return %arg0, %arg1 : i32, i32
  }
}

</mosaic_0001>

<bundles_post_ra>
// kernel: tpu_custom_call.1
= control target key start
LH: loop header
LB: loop body
LE: loop exit
PB: predicated region body
PF: predicated region fallthrough
CT: control target
= control target key end

     0   :  { %8 = vsyncpa [#allocation3], 0  ;;  %s349_s0 = inlined_call_operand.hbm [shape: bf16[16,128], index: 0, kind: input, shape index: {}]   ;;  %s350_s1 = inlined_call_operand.hbm [shape: bf16[128,128], index: 1, kind: input, shape index: {}]   ;;  %s351_s2 = inlined_call_operand.vmem [shape: f32[1,128], index: 2, kind: input, shape index: {}]   ;;  %s352_s3 = inlined_call_operand.hbm [shape: f32[16,128], index: 3, kind: output, shape index: {}]  }
   0x1   :  { %9 = vsyncpa [#allocation6], 0 }
   0x2   :  { %10 = vsyncpa [#allocation4], 0  ;;  %s15_s14 = sshll.u32 %s349_s0, 4  ;;  %s310_s15 = smov [#allocation2]   ;;  %s16_s14 = int_to_ptr.hbm [resolvable:$true] %s15_s14 }
   0x3   :  { %s17_s16 = sshll.u32 %s310_s15, 4  ;;  %s28_s19 = sshll.u32 %s350_s1, 4  ;;  %s18_s16 = int_to_ptr.vmem [resolvable:$true] %s17_s16  ;;  %s29_s19 = int_to_ptr.hbm [resolvable:$true] %s28_s19 }
   0x4   :  { %s311_s20 = smov 64   ;;  %s312_s21 = smov 4  }
   0x5   :  { %23 = dma.hbm_to_vmem [thread:$0]  %s16_s14, 128, %s18_s16, [#allocation3], %s311_s20, %s311_s20, %s312_s21  }
   0x6   :  { %s313_s22 = smov [#allocation5]  }
   0x7   :  { %s30_s23 = sshll.u32 %s313_s22, 4  ;;  %s31_s23 = int_to_ptr.vmem [resolvable:$true] %s30_s23 }
   0x8   :  { %36 = dma.hbm_to_vmem [thread:$0]  %s29_s19, 1024, %s31_s23, [#allocation6], %s311_s20, %s311_s20, %s312_s21  }
   0x9   :  { %304 = dma.done.wait [#allocation3], 128  }
   0xa   :  { %305 = vsyncadd [#allocation3], 4294967168 }
   0xb   :  { %306 = dma.done.wait [#allocation6], 1024  }
   0xc   :  { %307 = vsyncadd [#allocation6], 4294966272  ;;  %v222_v0 = vld [vmem:[#allocation5 + $0x38] sm:$0xff]  ;;  %v221_v1 = vld [vmem:[#allocation5 + $0x30] sm:$0xff]  ;;  %s314_s24 = smov [#allocation7]   ;;  %s164_s28 = sshll.u32 %s352_s3, 4  ;;  %s165_s28 = int_to_ptr.hbm [resolvable:$true] %s164_s28 }
   0xd   :  { %127 = vmatpush.bf16.msra.mxu0 %v222_v0  ;;  %v220_v2 = vld [vmem:[#allocation5 + $0x28] sm:$0xff]  ;;  %v219_v3 = vld [vmem:[#allocation5 + $0x20] sm:$0xff]  ;;  %v218_v4 = vld [vmem:[#allocation5 + $0x18] sm:$0xff]  ;;  %s162_s25 = sshll.u32 %s314_s24, 4  ;;  %s315_s29 = smov 128   ;;  %s163_s25 = int_to_ptr.vmem [resolvable:$true] %s162_s25 }
   0xe   :  { %v217_v5 = vld [vmem:[#allocation5 + $0x10] sm:$0xff]  ;;  %v216_v6 = vld [vmem:[#allocation5 + $0x8] sm:$0xff]  ;;  %v215_v7 = vld [vmem:[#allocation5] sm:$0xff]  ;;  %s316_s30 = smov 8  }
   0xf   :  { %v214_v8 = vld [vmem:[#allocation2] sm:$0xff] }
  0x10   :  { %v231_v9 = vld [vmem:[%s351_s2] ss:$0 sm:$0xff] }
  0x11   :  { %128 = vmatpush.bf16.msra.mxu0 %v221_v1 }
  0x15   :  { %129 = vmatpush.bf16.msra.mxu0 %v220_v2 }
  0x19   :  { %130 = vmatpush.bf16.msra.mxu0 %v219_v3 }
  0x1d   :  { %131 = vmatpush.bf16.msra.mxu0 %v218_v4 }
  0x21   :  { %132 = vmatpush.bf16.msra.mxu0 %v217_v5 }
  0x25   :  { %133 = vmatpush.bf16.msra.mxu0 %v216_v6 }
  0x29   :  { %134 = vmatpush.bf16.msra.mxu0 %v215_v7 }
  0x2c   :  { %135 = vmatmul.bf16.vlgmr.msra.gmra.mxu0 %v214_v8 }
  0xa9   :  { %v136_v10 = vpop.f32.mrf.mxu0 }
  0xaa   :  { %v154_v11 = vadd.f32 %v231_v9, %v136_v10 }
  0xac   :  { %156 = vst [vmem:[#allocation7] sm:$0xff] %v154_v11 }
  0xb1   :  { %v138_v12 = vpop.f32.mrf.mxu0 }
  0xb2   :  { %v155_v13 = vadd.f32 %v231_v9, %v138_v12 }
  0xb4   :  { %157 = vst [vmem:[#allocation7 + $0x8] sm:$0xff] %v155_v13 }
  0xb5   :  { %170 = dma.vmem_to_hbm [thread:$0]  %s163_s25, 256, %s165_s28, [#allocation4], %s315_s29, %s315_s29, %s316_s30  }
  0xb6   :  { %308 = dma.done.wait [#allocation4], 256  }
  0xb7   :  { %309 = vsyncadd [#allocation4], 4294967040 }
  0xb8   :  { %175 = vsyncpa [#allocation3], 1 }
  0xb9   :  { %176 = vsyncpa [#allocation6], 1 }
  0xba   :  { %177 = vsyncpa [#allocation4], 1 }

</bundles_post_ra>
